<compile_context>
chip_gen: v7x
topology: tpu7x:2x2x1
jax: 0.10.0
libtpu: 0.0.40
codegen_flags: <defaults>
</compile_context>

<pallas_src>
import functools

import jax
import jax.numpy as jnp
from jax.experimental import pallas as pl
from jax.experimental.pallas import tpu as pltpu


_LANE = 128
_ROW_TILE_CAP = 256                   # sublane-dim tile cap
_COL_TILE_CAP = 1024                  # lane-dim tile cap (256x1024 f32 = 1 MiB)
_VMEM_LIMIT = 32 * 1024 * 1024        # safe on v5e/v6e (128 MiB) and v7x (64 MiB)


# ------------------------------ tile helpers ------------------------------- #
def _row_tile(rows: int) -> int:
    """Row (sublane) tile; forces >=2 row blocks for rows > 8 so both v7x
    TensorCores get work even when the column grid collapses to one block."""
    if rows <= 8:
        return rows
    tr = min(_ROW_TILE_CAP, rows)
    if pl.cdiv(rows, tr) < 2:
        half = (rows + 1) // 2
        tr = max(8, ((half + 7) // 8) * 8)
    return tr


def _col_tile(cols: int, cap: int = _COL_TILE_CAP) -> int:
    """Lane tile that exactly divides `cols` (cols is a power of two here)."""
    return cols if cols <= cap else cap


# ------------------------- main path: inner >= 128 ------------------------- #
def _ry_lane_kernel(cs_ref, x0a_ref, x0b_ref, x1a_ref, x1b_ref, y0_ref, y1_ref):
    # cs_ref: (2,) f32 in SMEM -> [cos(theta), sin(theta)]
    c = cs_ref[0]
    s = cs_ref[1]
    h = pl.program_id(2)               # which output half this step writes
    x0a = x0a_ref[...]
    x0b = x0b_ref[...]
    x1a = x1a_ref[...]
    x1b = x1b_ref[...]

    @pl.when(h == 0)                   # y(q'=0) =  c*x(q=0) + s*x(q=1)
    def _():
        y0_ref[...] = (c * x0a + s * x0b).astype(y0_ref.dtype)
        y1_ref[...] = (c * x1a + s * x1b).astype(y1_ref.dtype)

    @pl.when(h == 1)                   # y(q'=1) = -s*x(q=0) + c*x(q=1)
    def _():
        y0_ref[...] = (c * x0b - s * x0a).astype(y0_ref.dtype)
        y1_ref[...] = (c * x1b - s * x1a).astype(y1_ref.dtype)


def _apply_lane_aligned(x0, x1, cs, outer, inner):
    assert inner % _LANE == 0
    B, D = x0.shape
    R = B * outer
    C = 2 * inner

    # Free row-major views: row = (batch, outer) index, columns = [xa | xb].
    x0v = x0.reshape(R, C)
    x1v = x1.reshape(R, C)

    tr = _row_tile(R)
    tc = _col_tile(inner)
    nj = inner // tc
    grid = (pl.cdiv(R, tr), nj, 2)     # h innermost -> inputs reused across h

    a_spec = pl.BlockSpec((tr, tc), lambda i, j, h: (i, j))
    b_spec = pl.BlockSpec((tr, tc), lambda i, j, h: (i, j + nj))
    o_spec = pl.BlockSpec((tr, tc), lambda i, j, h: (i, h * nj + j))
    smem_spec = pl.BlockSpec(memory_space=pltpu.MemorySpace.SMEM)

    itemsize = jnp.dtype(x0.dtype).itemsize
    cost = pl.CostEstimate(
        flops=6 * B * D,                       # 4 mul + 2 add per pair, 2 batches
        transcendentals=0,
        bytes_accessed=4 * B * D * itemsize,   # read x0,x1 once; write y0,y1 once
    )

    y0, y1 = pl.pallas_call(
        _ry_lane_kernel,
        out_shape=(jax.ShapeDtypeStruct((R, C), x0.dtype),
                   jax.ShapeDtypeStruct((R, C), x1.dtype)),
        grid=grid,
        in_specs=[smem_spec, a_spec, b_spec, a_spec, b_spec],
        out_specs=(o_spec, o_spec),
        compiler_params=pltpu.CompilerParams(
            dimension_semantics=("parallel", "parallel", "arbitrary"),
            vmem_limit_bytes=_VMEM_LIMIT),
        cost_estimate=cost,
    )(cs, x0v, x0v, x1v, x1v)

    return y0.reshape(B, D), y1.reshape(B, D)


# ----------------------- fallback path: inner < 128 ------------------------ #
def _ry_pair_kernel(cs_ref, x0a_ref, x0b_ref, x1a_ref, x1b_ref,
                    y0a_ref, y0b_ref, y1a_ref, y1b_ref):
    c = cs_ref[0]
    s = cs_ref[1]
    for xa_ref, xb_ref, ya_ref, yb_ref in (
            (x0a_ref, x0b_ref, y0a_ref, y0b_ref),
            (x1a_ref, x1b_ref, y1a_ref, y1b_ref)):
        xa = xa_ref[...]
        xb = xb_ref[...]
        ya_ref[...] = (c * xa + s * xb).astype(ya_ref.dtype)
        yb_ref[...] = (c * xb - s * xa).astype(yb_ref.dtype)


def _apply_small_inner(x0, x1, cs, outer, inner):
    # TODO(synk): for 8 <= inner < 128 a sublane-pair block layout would avoid
    # the XLA-side strided gather/scatter below; kept simple for the rare case.
    B, D = x0.shape
    D2 = D // 2

    def split(x):
        x4 = x.reshape(B, outer, 2, inner)
        return x4[:, :, 0, :].reshape(B, D2), x4[:, :, 1, :].reshape(B, D2)

    x0a, x0b = split(x0)
    x1a, x1b = split(x1)

    tr = _row_tile(B)
    tc = _col_tile(D2, cap=512)
    grid = (pl.cdiv(B, tr), D2 // tc)

    blk = pl.BlockSpec((tr, tc), lambda i, j: (i, j))
    smem_spec = pl.BlockSpec(memory_space=pltpu.MemorySpace.SMEM)

    itemsize = jnp.dtype(x0.dtype).itemsize
    cost = pl.CostEstimate(flops=6 * B * D, transcendentals=0,
                           bytes_accessed=4 * B * D * itemsize)

    y0a, y0b, y1a, y1b = pl.pallas_call(
        _ry_pair_kernel,
        out_shape=tuple(jax.ShapeDtypeStruct((B, D2), x0.dtype)
                        for _ in range(4)),
        grid=grid,
        in_specs=[smem_spec, blk, blk, blk, blk],
        out_specs=(blk, blk, blk, blk),
        compiler_params=pltpu.CompilerParams(
            dimension_semantics=("parallel", "parallel"),
            vmem_limit_bytes=_VMEM_LIMIT),
        cost_estimate=cost,
    )(cs, x0a, x0b, x1a, x1b)

    def merge(ya, yb):
        return jnp.stack([ya.reshape(B, outer, inner),
                          yb.reshape(B, outer, inner)], axis=2).reshape(B, D)

    return merge(y0a, y0b), merge(y1a, y1b)


# ------------------------------- dispatcher -------------------------------- #
def ry_apply_pallas(x0: jax.Array, x1: jax.Array, theta: jax.Array,
                    n_qubit: int, index: int):
    """Apply RY(theta) on qubit `index` to both state batches (x @ op)."""
    B, D = x0.shape
    assert x1.shape == (B, D) and D == 2 ** n_qubit
    outer = 2 ** index
    inner = 2 ** (n_qubit - index - 1)

    cos = jnp.cos(theta).reshape(-1)[:1]
    sin = jnp.sin(theta).reshape(-1)[:1]
    cs = jnp.concatenate([cos, sin]).astype(jnp.float32)      # (2,) -> SMEM

    if inner % _LANE == 0:
        return _apply_lane_aligned(x0, x1, cs, outer, inner)
    return _apply_small_inner(x0, x1, cs, outer, inner)


# --------------------- dense reference (validation only) ------------------- #
def make_ry_op(theta: jax.Array, n_qubit: int, index: int) -> jax.Array:
    """op = eye(2^index) (x) RY(theta) (x) eye(2^(n_qubit-index-1))."""
    cos = jnp.cos(theta)
    sin = jnp.sin(theta)
    ry = jnp.concatenate([cos, -sin, sin, cos], axis=-1).reshape(2, 2)
    id1 = jnp.eye(2 ** index, dtype=jnp.float32)
    id2 = jnp.eye(2 ** (n_qubit - index - 1), dtype=jnp.float32)
    return functools.reduce(jnp.kron, [id1, ry.astype(jnp.float32), id2])


# ----------------------------- RY module glue ------------------------------ #
class RYPallas:
    def __init__(self, n_qubit: int, index: int, init_method="zero", key=None):
        self.n_qubit = n_qubit
        self.index = index
        if init_method == "zero":
            self.params = jnp.zeros((1,), dtype=jnp.float32)
        elif init_method == "uniform":
            assert key is not None
            self.params = (jax.random.uniform(key, (1,)) * 2.0 - 1.0) * jnp.pi
        else:
            raise ValueError("init_method must be either 'zero' or 'uniform'!")

    def __call__(self, x: tuple):
        y0, y1 = ry_apply_pallas(x[0], x[1], self.params,
                                 self.n_qubit, self.index)
        return (y0, y1)

    def to_matrix(self):
        return make_ry_op(self.params, self.n_qubit, self.index)


# ---------------------------------- main ----------------------------------- #
if __name__ == "__main__":
    key = jax.random.PRNGKey(0)
    # (n_qubit, index, batch): lane-aligned path, index=0 edge, small-inner
    # fallback, and the inner=1 edge.
    configs = [
        (9, 1, 4),    # inner = 128 -> single-pass lane-aligned kernel
        (9, 0, 4),    # inner = 256, outer = 1 edge
        (5, 2, 4),    # inner = 4   -> small-inner fallback kernel
        (5, 4, 4),    # inner = 1   -> smallest-inner edge
    ]
    for (n_qubit, index, batch) in configs:
        key, k_param, k_x0, k_x1 = jax.random.split(key, 4)
        D = 2 ** n_qubit
        module = RYPallas(n_qubit, index, init_method="uniform", key=k_param)

        x0 = jax.random.normal(k_x0, (batch, D), dtype=jnp.float32)
        x1 = jax.random.normal(k_x1, (batch, D), dtype=jnp.float32)

        y0, y1 = module((x0, x1))
        jax.block_until_ready((y0, y1))

        # Pure-JAX dense reference of the full forward semantics.
        op_ref = make_ry_op(module.params, n_qubit, index)
        assert jnp.allclose(y0, x0 @ op_ref, atol=1e-5, rtol=1e-5)
        assert jnp.allclose(y1, x1 @ op_ref, atol=1e-5, rtol=1e-5)

    print("KERNEL_OK")
</pallas_src>

<mosaic_0001>
module attributes {stable_mosaic.version = 11 : i64} {
  func.func @_ry_lane_kernel(%arg0: i32, %arg1: i32, %arg2: i32, %arg3: memref<2xf32, #tpu.memory_space<smem>>, %arg4: memref<8x128xf32, #tpu.memory_space<vmem>>, %arg5: memref<8x128xf32, #tpu.memory_space<vmem>>, %arg6: memref<8x128xf32, #tpu.memory_space<vmem>>, %arg7: memref<8x128xf32, #tpu.memory_space<vmem>>, %arg8: memref<8x128xf32, #tpu.memory_space<vmem>>, %arg9: memref<8x128xf32, #tpu.memory_space<vmem>>) attributes {dimension_semantics = [#tpu.dimension_semantics<parallel>, #tpu.dimension_semantics<parallel>, #tpu.dimension_semantics<arbitrary>], iteration_bounds = array<i64: 1, 1, 2>, scalar_prefetch = 0 : i64, scratch_operands = 0 : i64, tpu.core_type = #tpu.core_type<tc>, window_params = [{transform_indices = @transform_0, window_bounds = array<i64: 2>}, {transform_indices = @transform_1, window_bounds = array<i64: 8, 128>}, {transform_indices = @transform_2, window_bounds = array<i64: 8, 128>}, {transform_indices = @transform_3, window_bounds = array<i64: 8, 128>}, {transform_indices = @transform_4, window_bounds = array<i64: 8, 128>}, {transform_indices = @transform_5, window_bounds = array<i64: 8, 128>}, {transform_indices = @transform_6, window_bounds = array<i64: 8, 128>}]} {
    %c0 = arith.constant 0 : index
    %0 = memref.load %arg3[%c0] : memref<2xf32, #tpu.memory_space<smem>>
    %c1 = arith.constant 1 : index
    %1 = memref.load %arg3[%c1] : memref<2xf32, #tpu.memory_space<smem>>
    %c0_0 = arith.constant 0 : index
    %c0_1 = arith.constant 0 : index
    %2 = vector.load %arg4[%c0_0, %c0_1] : memref<8x128xf32, #tpu.memory_space<vmem>>, vector<8x128xf32>
    %c0_2 = arith.constant 0 : index
    %c0_3 = arith.constant 0 : index
    %3 = vector.load %arg5[%c0_2, %c0_3] : memref<8x128xf32, #tpu.memory_space<vmem>>, vector<8x128xf32>
    %c0_4 = arith.constant 0 : index
    %c0_5 = arith.constant 0 : index
    %4 = vector.load %arg6[%c0_4, %c0_5] : memref<8x128xf32, #tpu.memory_space<vmem>>, vector<8x128xf32>
    %c0_6 = arith.constant 0 : index
    %c0_7 = arith.constant 0 : index
    %5 = vector.load %arg7[%c0_6, %c0_7] : memref<8x128xf32, #tpu.memory_space<vmem>>, vector<8x128xf32>
    %c0_i32 = arith.constant 0 : i32
    %6 = arith.cmpi eq, %arg2, %c0_i32 : i32
    %7 = arith.extui %6 : i1 to i32
    %c0_i32_8 = arith.constant 0 : i32
    %8 = arith.cmpi ne, %7, %c0_i32_8 : i32
    scf.if %8 {
      %12 = vector.broadcast %0 : f32 to vector<8x128xf32>
      %13 = arith.mulf %12, %2 : vector<8x128xf32>
      %14 = vector.broadcast %1 : f32 to vector<8x128xf32>
      %15 = arith.mulf %14, %3 : vector<8x128xf32>
      %16 = arith.addf %13, %15 : vector<8x128xf32>
      %c0_10 = arith.constant 0 : index
      %c0_11 = arith.constant 0 : index
      %17 = vector.load %arg8[%c0_10, %c0_11] : memref<8x128xf32, #tpu.memory_space<vmem>>, vector<8x128xf32>
      tpu.vector_store %arg8[%c0_10, %c0_11], %16 {strides = array<i32>} : memref<8x128xf32, #tpu.memory_space<vmem>>, vector<8x128xf32>,
      %18 = vector.broadcast %0 : f32 to vector<8x128xf32>
      %19 = arith.mulf %18, %4 : vector<8x128xf32>
      %20 = vector.broadcast %1 : f32 to vector<8x128xf32>
      %21 = arith.mulf %20, %5 : vector<8x128xf32>
      %22 = arith.addf %19, %21 : vector<8x128xf32>
      %c0_12 = arith.constant 0 : index
      %c0_13 = arith.constant 0 : index
      %23 = vector.load %arg9[%c0_12, %c0_13] : memref<8x128xf32, #tpu.memory_space<vmem>>, vector<8x128xf32>
      tpu.vector_store %arg9[%c0_12, %c0_13], %22 {strides = array<i32>} : memref<8x128xf32, #tpu.memory_space<vmem>>, vector<8x128xf32>,
    } else {
    }
    %c1_i32 = arith.constant 1 : i32
    %9 = arith.cmpi eq, %arg2, %c1_i32 : i32
    %10 = arith.extui %9 : i1 to i32
    %c0_i32_9 = arith.constant 0 : i32
    %11 = arith.cmpi ne, %10, %c0_i32_9 : i32
    scf.if %11 {
      %12 = vector.broadcast %0 : f32 to vector<8x128xf32>
      %13 = arith.mulf %12, %3 : vector<8x128xf32>
      %14 = vector.broadcast %1 : f32 to vector<8x128xf32>
      %15 = arith.mulf %14, %2 : vector<8x128xf32>
      %16 = arith.subf %13, %15 : vector<8x128xf32>
      %c0_10 = arith.constant 0 : index
      %c0_11 = arith.constant 0 : index
      %17 = vector.load %arg8[%c0_10, %c0_11] : memref<8x128xf32, #tpu.memory_space<vmem>>, vector<8x128xf32>
      tpu.vector_store %arg8[%c0_10, %c0_11], %16 {strides = array<i32>} : memref<8x128xf32, #tpu.memory_space<vmem>>, vector<8x128xf32>,
      %18 = vector.broadcast %0 : f32 to vector<8x128xf32>
      %19 = arith.mulf %18, %5 : vector<8x128xf32>
      %20 = vector.broadcast %1 : f32 to vector<8x128xf32>
      %21 = arith.mulf %20, %4 : vector<8x128xf32>
      %22 = arith.subf %19, %21 : vector<8x128xf32>
      %c0_12 = arith.constant 0 : index
      %c0_13 = arith.constant 0 : index
      %23 = vector.load %arg9[%c0_12, %c0_13] : memref<8x128xf32, #tpu.memory_space<vmem>>, vector<8x128xf32>
      tpu.vector_store %arg9[%c0_12, %c0_13], %22 {strides = array<i32>} : memref<8x128xf32, #tpu.memory_space<vmem>>, vector<8x128xf32>,
    } else {
    }
    return
  }
  func.func @transform_0(%arg0: i32, %arg1: i32, %arg2: i32) -> i32 {
    %c0_i32 = arith.constant 0 : i32
    %c0_i32_0 = arith.constant 0 : i32
    return %c0_i32 : i32
  }
  func.func @transform_1(%arg0: i32, %arg1: i32, %arg2: i32) -> (i32, i32) {
    %c0_i32 = arith.constant 0 : i32
    return %arg0, %arg1 : i32, i32
  }
  func.func @transform_2(%arg0: i32, %arg1: i32, %arg2: i32) -> (i32, i32) {
    %c1_i32 = arith.constant 1 : i32
    %0 = arith.addi %arg1, %c1_i32 : i32
    %c0_i32 = arith.constant 0 : i32
    return %arg0, %0 : i32, i32
  }
  func.func @transform_3(%arg0: i32, %arg1: i32, %arg2: i32) -> (i32, i32) {
    %c0_i32 = arith.constant 0 : i32
    return %arg0, %arg1 : i32, i32
  }
  func.func @transform_4(%arg0: i32, %arg1: i32, %arg2: i32) -> (i32, i32) {
    %c1_i32 = arith.constant 1 : i32
    %0 = arith.addi %arg1, %c1_i32 : i32
    %c0_i32 = arith.constant 0 : i32
    return %arg0, %0 : i32, i32
  }
  func.func @transform_5(%arg0: i32, %arg1: i32, %arg2: i32) -> (i32, i32) {
    %c1_i32 = arith.constant 1 : i32
    %0 = arith.muli %arg2, %c1_i32 : i32
    %1 = arith.addi %0, %arg1 : i32
    %c0_i32 = arith.constant 0 : i32
    return %arg0, %1 : i32, i32
  }
  func.func @transform_6(%arg0: i32, %arg1: i32, %arg2: i32) -> (i32, i32) {
    %c1_i32 = arith.constant 1 : i32
    %0 = arith.muli %arg2, %c1_i32 : i32
    %1 = arith.addi %0, %arg1 : i32
    %c0_i32 = arith.constant 0 : i32
    return %arg0, %1 : i32, i32
  }
}

</mosaic_0001>

<bundles_post_ra>
// kernel: tpu_custom_call.1
= control target key start
LH: loop header
LB: loop body
LE: loop exit
PB: predicated region body
PF: predicated region fallthrough
CT: control target
= control target key end

     0   :  { %s1348_s0 = inlined_call_operand.hbm [shape: f32[2], index: 0, kind: input, shape index: {}]   ;;  %s1349_s1 = inlined_call_operand.hbm [shape: f32[8,256], index: 1, kind: input, shape index: {}]   ;;  %s1350_s2 = inlined_call_operand.hbm [shape: f32[8,256], index: 2, kind: input, shape index: {}]   ;;  %s1351_s3 = inlined_call_operand.hbm [shape: f32[8,256], index: 3, kind: input, shape index: {}]   ;;  %s1352_s4 = inlined_call_operand.hbm [shape: f32[8,256], index: 4, kind: input, shape index: {}]   ;;  %s1353_s5 = inlined_call_operand.hbm [shape: f32[8,256], index: 5, kind: output, shape index: {0}]   ;;  %s1354_s6 = inlined_call_operand.hbm [shape: f32[8,256], index: 6, kind: output, shape index: {1}]  }
   0x1   :  { %1363 = sst [smem:[#allocation22_spill]] %s1348_s0 }
   0x2   :  { %1364 = sst [smem:[#allocation23_spill]] %s1350_s2 }
   0x3   :  { %12 = vsyncpa [#allocation5], 0 }
   0x4   :  { %13 = vsyncpa [#allocation3], 0 }
   0x5   :  { %14 = vsyncpa [#allocation8], 0 }
   0x6   :  { %15 = vsyncpa [#allocation11], 0 }
   0x7   :  { %16 = vsyncpa [#allocation4], 0 }
   0x8   :  { %18 = vsyncpa [#allocation4 + $0x1], 0 }
   0x9   :  { %19 = vsyncpa [#allocation14], 0 }
   0xa   :  { %21 = vsyncpa [#allocation14 + $0x1], 0  ;;  %s1061_s21 = smov 0   ;;  %s1063_s22 = smov 0  }
   0xb   :  { %s1065_s23 = smov 0   ;;  %s1067_s24 = smov 0  }
   0xc   :  { %s1069_s25 = smov 0   ;;  %s1071_s26 = smov 0  }
   0xd LB: > { %s624_s27 = sadd.s32 4294967295, %s1017_s26   ;;  %s625_s28 = sadd.s32 4294967294, %s1017_s26   ;;  %s1017_s26 = sphi %s1071_s26, %s27_s26   ;;  %s1013_s25 = sphi %s1069_s25, %s1385_s25   ;;  %s1009_s24 = sphi %s1067_s24, %s1384_s24   ;;  %s1005_s23 = sphi %s1065_s23, %s1383_s23   ;;  %s1001_s22 = sphi %s1063_s22, %s1382_s22   ;;  %s997_s21 = sphi %s1061_s21, %s1381_s21  }
   0xe   : > { %s39_s29 = sadd.s32 1, %s1013_s25  ;;  %s194_s30 = sadd.s32 1, %s1005_s23 }
   0xf   : > { %p40_p0 = scmp.ge.s32.totalorder %s39_s29, 2  ;;  %p204_p1 = scmp.ne.s32.totalorder %s1005_s23, %s1001_s22 }
  0x10   : > { %p205_p2 = scmp.eq.s32.totalorder %s624_s27, 1  ;;  %p210_p3 = scmp.ne.s32.totalorder %s1001_s22, %s997_s21 }
  0x11   : > { %s1387_s29 = smov (%p40_p0, %s39_s29), 0  ;;  %p211_p5 = scmp.eq.s32.totalorder %s625_s28, 1 }
  0x12   : > { %1365 = sst [smem:[#allocation21_spill]] %s1387_s29  ;;  %p1101_p4 = por %p205_p2, %p204_p1 }
  0x13   : > { %s190_s8 = ssub.s32 %s1013_s25, %s1387_s29  ;;  %p626_p6 = scmp.ge.s32.totalorder %s1017_s26, 1 }
  0x14   : > { %s1366_s7 = scalar_select %p1101_p4, 1, 0 }
  0x15   : > { %p192_p7 = scmp.eq.s32.totalorder %s190_s8, 0  ;;  %p1108_p8 = por %p211_p5, %p210_p3 }
  0x16   : > { %p248_p9 = scmp.lt.s32.totalorder %s1017_s26, 3  ;;  %p1120_p11 = scmp.eq.s32.totalorder %s624_s27, 0 }
  0x17   : > { %s1367_s9 = scalar_select %p1108_p8, 1, 0 }
  0x18   : > { %s1114_s10 = scalar_select %p192_p7, %s1005_s23, %s194_s30  }
  0x19   : > { %p1116_p10 = pnand %p626_p6, %p248_p9  ;;  %s1370_s2 = sld [smem:[#allocation23_spill]] }
  0x1a   : > { %s1369_s12 = scalar_select %p1120_p11, 1, 0 }
  0x1b   : > { %s1368_s11 = scalar_select %p1116_p10, 1, 0 }
  0x1c   : > { %p673_p12 = pneg %p1116_p10  ;;  %s1019_s16 = smov [#allocation7]  }
  0x1d   : > { %s290_s17 = sshll.u32 %s1019_s16, 4  ;;  %s1020_s19 = smov [#allocation6]   ;;  %s291_s17 = int_to_ptr.vmem [resolvable:$true] %s290_s17 }
  0x1e   : > { %p1133_p13 = pnand %p1120_p11, %p673_p12  ;;  %s1137_s20 = sshll.u32 %s1020_s19, 4  ;;  %s275_s20 = int_to_ptr.vmem [resolvable:$true] %s1137_s20 }
  0x1f   : > { %s1127_s15 = scalar_lea.hbm %s1370_s2, 128  ;;  %s790_s30 = scalar_lea.hbm %s1370_s2, 256 }
  0x20   : > { %s1371_s18 = scalar_select %p1133_p13, 1, 0 }
  0x21   : > { %p761_p0 = scmp.ne.s32.totalorder %s1127_s15, %s790_s30  ;;  %p1145_p1 = pneg %p1133_p13 }
  0x22   : > { %p766_p5 = scmp.lt.u32.totalorder %s1127_s15, %s1370_s2  ;;  %p767_p6 = scmp.lt.u32.totalorder %s790_s30, %s790_s30 }
  0x23   : > { %p763_p2 = pnand %p1145_p1, %p761_p0  ;;  %p769_p9 = scmp.lt.u32.totalorder %s790_s30, %s1127_s15 }
  0x24   : > { %p768_p7 = por %p767_p6, %p766_p5 }
  0x25   : > { %p764_p3 = pneg %p763_p2 }
  0x26   : > { %p770_p12 = por %p769_p9, %p768_p7 }
  0x28   : > { %p771_p8 = pnand %p770_p12, %p764_p3 }
  0x2a   : > { %774 = shalt.err (!%p771_p8)
}
  0x2b   : > { %s775_s16 = scalar_lea.vmem %s291_s17, 128  ;;  %p783_p13 = scmp.lt.s32.totalorder %s291_s17, %s291_s17 }
  0x2c   : > { %p776_p4 = scmp.ne.s32.totalorder %s291_s17, %s775_s16  ;;  %p784_p0 = scmp.lt.s32.totalorder %s775_s16, %s775_s16 }
  0x2e   : > { %p778_p11 = pnand %p776_p4, %p1145_p1  ;;  %p785_p2 = por %p784_p0, %p783_p13 }
  0x30   : > { %p779_p10 = pneg %p778_p11 }
  0x32   : > { %p786_p5 = pnand %p785_p2, %p779_p10 }
  0x34   : > { %789 = shalt.err (!%p786_p5)
}
  0x35   : > { %p1373_p6 = scmp.ne.s32.totalorder %s1371_s18, 0  ;;  %s1374_s0 = sld [smem:[#allocation22_spill]] }
  0x37   : > { %682 = dma.hbm_to_vmem [thread:$0]  (!%p1373_p6), %s1127_s15, 128, %s291_s17, [#allocation8]  }
  0x3b   : > { %s791_s28 = scalar_lea.hbm %s1374_s0, 16 }
  0x3c   : > { %p792_p8 = scmp.ne.s32.totalorder %s1374_s0, %s791_s28  ;;  %p798_p10 = scmp.lt.u32.totalorder %s791_s28, %s1374_s0 }
  0x3e   : > { %p794_p4 = pnand %p792_p8, %p1145_p1 }
  0x40   : > { %p795_p11 = pneg %p794_p4 }
  0x42   : > { %p800_p13 = pnand %p798_p10, %p795_p11 }
  0x44   : > { %803 = shalt.err (!%p800_p13)
}
  0x45   : > { %s1021_s2 = smov [#allocation2]   ;;  %s804_s30 = scalar_lea.hbm %s1349_s1, 128 }
  0x46   : > { %676 = dma.hbm_to_smem (!%p1373_p6), %s1374_s0, 16, %s1021_s2, [#allocation5]  }
  0x47   : > { %p805_p3 = scmp.ne.s32.totalorder %s1349_s1, %s804_s30  ;;  %s809_s16 = scalar_lea.hbm %s1349_s1, 256 }
  0x48   : > { %p810_p12 = scmp.lt.u32.totalorder %s809_s16, %s804_s30  ;;  %p811_p0 = scmp.lt.u32.totalorder %s804_s30, %s1349_s1 }
  0x49   : > { %p807_p7 = pnand %p805_p3, %p1145_p1 }
  0x4a   : > { %p812_p2 = por %p811_p0, %p810_p12 }
  0x4b   : > { %p808_p9 = pneg %p807_p7 }
  0x4d   : > { %p813_p5 = pnand %p812_p2, %p808_p9 }
  0x4f   : > { %816 = shalt.err (!%p813_p5)
}
  0x50   : > { %s817_s2 = scalar_lea.vmem %s275_s20, 128  ;;  %p825_p10 = scmp.lt.s32.totalorder %s275_s20, %s275_s20 }
  0x51   : > { %p818_p8 = scmp.ne.s32.totalorder %s275_s20, %s817_s2  ;;  %p826_p13 = scmp.lt.s32.totalorder %s817_s2, %s817_s2 }
  0x53   : > { %p820_p4 = pnand %p818_p8, %p1145_p1  ;;  %p827_p3 = por %p826_p13, %p825_p10 }
  0x55   : > { %p821_p11 = pneg %p820_p4 }
  0x57   : > { %p828_p7 = pnand %p827_p3, %p821_p11 }
  0x59   : > { %831 = shalt.err (!%p828_p7)
}
  0x5a   : > { %679 = dma.hbm_to_vmem [thread:$0]  (!%p1373_p6), %s1349_s1, 128, %s275_s20, [#allocation3]  }
  0x5b   : > { %s1022_s27 = smov [#allocation9]   ;;  %s1202_s14 = scalar_lea.hbm %s1352_s4, 128 }
  0x5c   : > { %s305_s30 = sshll.u32 %s1022_s27, 4  ;;  %s832_s17 = scalar_lea.hbm %s1351_s3, 128  ;;  %s306_s30 = int_to_ptr.vmem [resolvable:$true] %s305_s30 }
  0x5d   : > { %p833_p9 = scmp.ne.s32.totalorder %s1351_s3, %s832_s17  ;;  %s837_s19 = scalar_lea.hbm %s1351_s3, 256 }
  0x5e   : > { %p838_p2 = scmp.lt.u32.totalorder %s837_s19, %s832_s17  ;;  %p839_p5 = scmp.lt.u32.totalorder %s832_s17, %s1351_s3 }
  0x5f   : > { %p835_p12 = pnand %p833_p9, %p1145_p1 }
  0x60   : > { %p840_p8 = por %p839_p5, %p838_p2 }
  0x61   : > { %p836_p0 = pneg %p835_p12 }
  0x63   : > { %p841_p4 = pnand %p840_p8, %p836_p0 }
  0x65   : > { %844 = shalt.err (!%p841_p4)
}
  0x66   : > { %s845_s28 = scalar_lea.vmem %s306_s30, 128  ;;  %p853_p3 = scmp.lt.s32.totalorder %s306_s30, %s306_s30 }
  0x67   : > { %p846_p11 = scmp.ne.s32.totalorder %s306_s30, %s845_s28  ;;  %p854_p7 = scmp.lt.s32.totalorder %s845_s28, %s845_s28 }
  0x69   : > { %p848_p10 = pnand %p846_p11, %p1145_p1  ;;  %p855_p9 = por %p854_p7, %p853_p3 }
  0x6b   : > { %p849_p13 = pneg %p848_p10 }
  0x6d   : > { %p856_p12 = pnand %p855_p9, %p849_p13 }
  0x6f   : > { %859 = shalt.err (!%p856_p12)
}
  0x70   : > { %685 = dma.hbm_to_vmem [thread:$0]  (!%p1373_p6), %s1351_s3, 128, %s306_s30, [#allocation8]  }
  0x71   : > { %s1023_s15 = smov [#allocation10]   ;;  %s890_s29 = scalar_lea.hbm %s1352_s4, 256 }
  0x72   : > { %s321_s17 = sshll.u32 %s1023_s15, 4  ;;  %p861_p0 = scmp.ne.s32.totalorder %s1202_s14, %s890_s29  ;;  %s322_s17 = int_to_ptr.vmem [resolvable:$true] %s321_s17 }
  0x73   : > { %p866_p8 = scmp.lt.u32.totalorder %s1202_s14, %s1352_s4  ;;  %p867_p4 = scmp.lt.u32.totalorder %s890_s29, %s890_s29 }
  0x74   : > { %p863_p2 = pnand %p861_p0, %p1145_p1  ;;  %p869_p10 = scmp.lt.u32.totalorder %s890_s29, %s1202_s14 }
  0x75   : > { %p868_p11 = por %p867_p4, %p866_p8 }
  0x76   : > { %p864_p5 = pneg %p863_p2 }
  0x77   : > { %p870_p13 = por %p869_p10, %p868_p11 }
  0x79   : > { %p871_p3 = pnand %p870_p13, %p864_p5 }
  0x7b   : > { %874 = shalt.err (!%p871_p3)
}
  0x7c   : > { %s875_s30 = scalar_lea.vmem %s322_s17, 128  ;;  %p883_p6 = scmp.lt.s32.totalorder %s322_s17, %s322_s17 }
  0x7d   : > { %p876_p7 = scmp.ne.s32.totalorder %s322_s17, %s875_s30  ;;  %p884_p0 = scmp.lt.s32.totalorder %s875_s30, %s875_s30 }
  0x7f   : > { %p878_p9 = pnand %p876_p7, %p1145_p1  ;;  %p885_p2 = por %p884_p0, %p883_p6 }
  0x81   : > { %p879_p12 = pneg %p878_p9 }
  0x83   : > { %p886_p4 = pnand %p885_p2, %p879_p12 }
  0x85   : > { %889 = shalt.err (!%p886_p4)
}
  0x86   : > { %p1375_p8 = scmp.ne.s32.totalorder %s1371_s18, 0  ;;  %p1376_p10 = scmp.ne.s32.totalorder %s1368_s11, 0 }
  0x87   : > { %p1377_p5 = scmp.ne.s32.totalorder (!%p1376_p10), %s1369_s12, 0 }
  0x88   : > { %688 = dma.hbm_to_vmem [thread:$0]  (!%p1375_p8), %s1202_s14, 128, %s322_s17, [#allocation11]  }
  0x89   : > { %334 = sbr.rel (%p1376_p10) target bundleno = 224 (0xe0), region = 40 }
  0x90   : > { %972 = dma.done.wait (%p1377_p5), [#allocation5], 16  }
  0x91   : > { %974 = vsyncadd (%p1377_p5), [#allocation5], 4294967280 }
  0x92   : > { %976 = dma.done.wait (%p1377_p5), [#allocation3], 128  }
  0x93   : > { %978 = vsyncadd (%p1377_p5), [#allocation3], 4294967168 }
  0x94   : > { %980 = dma.done.wait (%p1377_p5), [#allocation8], 256  }
  0x95   : > { %982 = vsyncadd (%p1377_p5), [#allocation8], 4294967040 }
  0x96   : > { %984 = dma.done.wait (%p1377_p5), [#allocation11], 128  }
  0x97   : > { %986 = vsyncadd (%p1377_p5), [#allocation11], 4294967168 }
  0x98   : > { %356 = sfence }
  0x99   : > { %s1260_s11 = sand.u32 1, %s1001_s22   ;;  %s385_s18 = sld [smem:[#allocation2]]  ;;  %v387_v0 = vld [vmem:[#allocation6] sm:$0xff]  ;;  %v388_v1 = vld [vmem:[#allocation7] sm:$0xff]  ;;  %v389_v2 = vld [vmem:[#allocation9] sm:$0xff] }
  0x9a   : > { %s638_s8 = sshll.u32 %s1260_s11, 3  ;;  %s640_s14 = sld [smem:[#allocation2 + $0x1]]  ;;  %v390_v3 = vld [vmem:[#allocation10] sm:$0xff] }
  0x9b   : > { %s1263_s13 = scalar_lea.vmem [#allocation12], %s638_s8  ;;  %s1265_s28 = scalar_lea.vmem [#allocation13], %s638_s8 }
  0x9c   : > { %p641_p1 = scmp.ne.s32.totalorder %s1009_s24, 0 }
  0x9e   : > { %394 = sbr.rel (%p641_p1) target bundleno = 166 (0xa6), region = 64 }
  0x9f   : > { %v395_v4 = vstv (!%p641_p1), %s385_s18 }
  0xa0   : > { %v397_v5 = vstv (!%p641_p1), %s640_s14  ;;  %v396_v6 = vmul.f32 (!%p641_p1), %v395_v4, %v387_v0  ;;  %v401_v8 = vmul.f32 (!%p641_p1), %v395_v4, %v389_v2 }
  0xa1   : > { %v398_v7 = vmul.f32 (!%p641_p1), %v397_v5, %v388_v1  ;;  %v402_v9 = vmul.f32 (!%p641_p1), %v397_v5, %v390_v3 }
  0xa3   : > { %v399_v10 = vadd.f32 (!%p641_p1), %v398_v7, %v396_v6  ;;  %v403_v11 = vadd.f32 (!%p641_p1), %v402_v9, %v401_v8 }
  0xa5   : > { %400 = vst [vmem:[%s1263_s13] sm:$0xff] %v399_v10  ;;  %404 = vst [vmem:[%s1265_s28] sm:$0xff] %v403_v11 }
  0xa6 PF: > { %p642_p6 = scmp.ne.s32.totalorder %s1009_s24, 1 }
  0xa7   : > { %v409_v12 = vstv (!%p642_p6), %s385_s18  ;;  %v411_v13 = vstv (!%p642_p6), %s640_s14 }
  0xa8   : > { %408 = sbr.rel (%p642_p6) target bundleno = 175 (0xaf), region = 68  ;;  %v410_v14 = vmul.f32 (!%p642_p6), %v409_v12, %v388_v1  ;;  %v412_v15 = vmul.f32 (!%p642_p6), %v411_v13, %v387_v0  ;;  %v415_v16 = vmul.f32 (!%p642_p6), %v409_v12, %v390_v3  ;;  %v416_v17 = vmul.f32 (!%p642_p6), %v411_v13, %v389_v2 }
  0xaa   : > { %v413_v18 = vsub.f32 (!%p642_p6), %v410_v14, %v412_v15  ;;  %v417_v19 = vsub.f32 (!%p642_p6), %v415_v16, %v416_v17 }
  0xac   : > { %414 = vst [vmem:[%s1263_s13] sm:$0xff] (!%p642_p6), %v413_v18  ;;  %418 = vst [vmem:[%s1265_s28] sm:$0xff] (!%p642_p6), %v417_v19 }
  0xaf PF: > { %s645_s12 = sshll.u32 %s1009_s24, 7  ;;  %s441_s17 = sshll.u32 %s1263_s13, 4  ;;  %s442_s17 = int_to_ptr.vmem [resolvable:$true] %s441_s17 }
  0xb0   : > { %s1279_s15 = scalar_lea.hbm %s1353_s5, %s645_s12  ;;  %s420_s2 = scalar_lea.sflag [#allocation4], %s1260_s11 }
  0xb1   : > { %s891_s20 = scalar_lea.vmem %s442_s17, 128  ;;  %p1378_p13 = scmp.ne.s32.totalorder %s1366_s7, 0 }
  0xb2   : > { %p892_p11 = scmp.ne.s32.totalorder %s442_s17, %s891_s20  ;;  %s1024_s29 = smov [#allocation12]  }
  0xb3   : > { %s895_s19 = sshll.u32 %s1024_s29, 4  ;;  %s896_s19 = int_to_ptr.vmem [resolvable:$false] %s895_s19 }
  0xb4   : > { %p893_p3 = pnand %p892_p11, %p1378_p13  ;;  %s897_s27 = scalar_lea.vmem %s896_s19, 256 }
  0xb5   : > { %p898_p9 = scmp.lt.s32.totalorder %s442_s17, %s896_s19  ;;  %p899_p12 = scmp.lt.s32.totalorder %s897_s27, %s891_s20 }
  0xb6   : > { %p894_p7 = pneg %p893_p3 }
  0xb7   : > { %p900_p0 = por %p899_p12, %p898_p9 }
  0xb9   : > { %p901_p2 = pnand %p900_p0, %p894_p7 }
  0xbb   : > { %904 = shalt.err (!%p901_p2)
}
  0xbc   : > { %s905_s30 = scalar_lea.hbm %s1279_s15, 128  ;;  %s909_s14 = scalar_lea.hbm %s1353_s5, 256 }
  0xbd   : > { %p906_p4 = scmp.ne.s32.totalorder %s1279_s15, %s905_s30  ;;  %p910_p5 = scmp.lt.u32.totalorder %s1279_s15, %s1353_s5 }
  0xbe   : > { %p911_p1 = scmp.lt.u32.totalorder %s909_s14, %s905_s30  ;;  %p913_p11 = scmp.lt.u32.totalorder %s905_s30, %s1279_s15 }
  0xbf   : > { %p907_p8 = pnand %p906_p4, %p1378_p13 }
  0xc0   : > { %p912_p6 = por %p911_p1, %p910_p5 }
  0xc1   : > { %p908_p10 = pneg %p907_p8 }
  0xc2   : > { %p914_p3 = por %p913_p11, %p912_p6 }
  0xc4   : > { %p915_p7 = pnand %p914_p3, %p908_p10 }
  0xc6   : > { %918 = shalt.err (!%p915_p7)
}
  0xc7   : > { %669 = dma.vmem_to_hbm [thread:$0]  (%p1378_p13), %s442_s17, 128, %s1279_s15, %s420_s2  }
  0xc8   : > { %s1305_s29 = scalar_lea.hbm %s1354_s6, %s645_s12  ;;  %s457_s19 = sshll.u32 %s1265_s28, 4  ;;  %s458_s19 = int_to_ptr.vmem [resolvable:$true] %s457_s19 }
  0xc9   : > { %s425_s27 = scalar_lea.sflag [#allocation14], %s1260_s11  ;;  %s919_s30 = scalar_lea.vmem %s458_s19, 128 }
  0xca   : > { %p920_p9 = scmp.ne.s32.totalorder %s458_s19, %s919_s30  ;;  %s1025_s18 = smov [#allocation13]  }
  0xcb   : > { %s923_s8 = sshll.u32 %s1025_s18, 4  ;;  %s924_s8 = int_to_ptr.vmem [resolvable:$false] %s923_s8 }
  0xcc   : > { %p921_p12 = pnand %p920_p9, %p1378_p13  ;;  %s925_s14 = scalar_lea.vmem %s924_s8, 256 }
  0xcd   : > { %p926_p2 = scmp.lt.s32.totalorder %s458_s19, %s924_s8  ;;  %p927_p4 = scmp.lt.s32.totalorder %s925_s14, %s919_s30 }
  0xce   : > { %p922_p0 = pneg %p921_p12 }
  0xcf   : > { %p928_p8 = por %p927_p4, %p926_p2 }
  0xd1   : > { %p929_p10 = pnand %p928_p8, %p922_p0 }
  0xd3   : > { %932 = shalt.err (!%p929_p10)
}
  0xd4   : > { %s933_s24 = scalar_lea.hbm %s1305_s29, 128  ;;  %s937_s12 = scalar_lea.hbm %s1354_s6, 256 }
  0xd5   : > { %p934_p5 = scmp.ne.s32.totalorder %s1305_s29, %s933_s24  ;;  %p938_p11 = scmp.lt.u32.totalorder %s1305_s29, %s1354_s6 }
  0xd6   : > { %p939_p3 = scmp.lt.u32.totalorder %s937_s12, %s933_s24  ;;  %p941_p9 = scmp.lt.u32.totalorder %s933_s24, %s1305_s29 }
  0xd7   : > { %p935_p1 = pnand %p934_p5, %p1378_p13 }
  0xd8   : > { %p940_p7 = por %p939_p3, %p938_p11 }
  0xd9   : > { %p936_p6 = pneg %p935_p1 }
  0xda   : > { %p942_p12 = por %p941_p9, %p940_p7 }
  0xdc   : > { %p943_p0 = pnand %p942_p12, %p936_p6 }
  0xde   : > { %946 = shalt.err (!%p943_p0)
}
  0xdf   : > { %670 = dma.vmem_to_hbm [thread:$0]  (%p1378_p13), %s458_s19, 128, %s1305_s29, %s425_s27  }
  0xe0 PF: > { %p706_p2 = scmp.ge.s32.totalorder %s1017_s26, 2  ;;  %s469_s2 = sand.u32 1, %s997_s21  }
  0xe1   : > { %p1379_p4 = scmp.ne.s32.totalorder %s1367_s9, 0  ;;  %s470_s13 = scalar_lea.sflag [#allocation4], %s469_s2 }
  0xe3   : > { %p690_p8 = pnand %p706_p2, %p1379_p4 }
  0xe5   : > { %988 = dma.done.wait (!%p690_p8), %s470_s13, 128  }
  0xe6   : > { %990 = vsyncadd (!%p690_p8), %s470_s13, 4294967168  ;;  %s479_s0 = scalar_lea.sflag [#allocation14], %s469_s2 }
  0xe7   : > { %992 = dma.done.wait (!%p690_p8), %s479_s0, 128  }
  0xe8   : > { %994 = vsyncadd (!%p690_p8), %s479_s0, 4294967168  ;;  %s27_s26 = sadd.s32 1, %s1017_s26   ;;  %s1380_s7 = sld [smem:[#allocation21_spill]] }
  0xe9   : > { %p24_p10 = scmp.ge.s32.totalorder %s27_s26, 4   ;;  %s1381_s21 = smov %s1001_s22 }
  0xea   : > { %s1382_s22 = smov %s1005_s23  ;;  %s1383_s23 = smov %s1114_s10 }
  0xeb   : > { %s1384_s24 = smov %s1013_s25  ;;  %26 = sbr.rel (!%p24_p10) target bundleno = 13 (0xd), region = 123 }
  0xee   : > { %s1385_s25 = smov %s1380_s7 }
  0xf2   :  { %484 = vsyncpa [#allocation3], 1 }
  0xf3   :  { %486 = vsyncpa [#allocation3 + $0x1], 1 }
  0xf4   :  { %487 = vsyncpa [#allocation8], 1 }
  0xf5   :  { %488 = vsyncpa [#allocation11], 1 }
  0xf6   :  { %489 = vsyncpa [#allocation4], 1 }
  0xf7   :  { %491 = vsyncpa [#allocation4 + $0x1], 1 }
  0xf8   :  { %492 = vsyncpa [#allocation14], 1 }
  0xf9   :  { %494 = vsyncpa [#allocation14 + $0x1], 1 }
  0xfa   :  { %495 = vsyncpa [#allocation5], 1 }
  0xfb   :  { %497 = vsyncpa [#allocation5 + $0x1], 1 }

</bundles_post_ra>
